<compile_context>
chip_gen: v7x
topology: tpu7x:2x2x1
jax: 0.10.0
libtpu: 0.0.40
codegen_flags: <defaults>
</compile_context>

<pallas_src>
import math
from functools import partial

import jax
import jax.numpy as jnp
from jax.experimental import pallas as pl
from jax.experimental.pallas import tpu as pltpu


def _round_up(a, m):
    return ((a + m - 1) // m) * m


def _make_dice_kernel(S, tile, ntps, need_mask):
    """Kernel over blocks x:(1,C,tile), y:(1,1,tile) -> three (1,1,C,1) accums."""

    def kernel(x_ref, y_ref, inter_ref, pred_ref, gt_ref):
        # Spatial-tile axis (grid axis 2) is the reduction axis: the output
        # blocks keep the same block index across it -> resident accumulators.
        @pl.when(pl.program_id(2) == 0)
        def _init():
            inter_ref[...] = jnp.zeros_like(inter_ref)
            pred_ref[...] = jnp.zeros_like(pred_ref)
            gt_ref[...] = jnp.zeros_like(gt_ref)

        x_blk = x_ref[0].astype(jnp.float32)       # (C, tile), widen in-register
        y_blk = y_ref[0].astype(jnp.int32)         # (1, tile) labels

        # Memory-efficient one-hot: channel-id iota compared against labels.
        cids = jax.lax.broadcasted_iota(jnp.int32, x_blk.shape, 0)
        cls_mask = y_blk == cids                    # (C, tile) bool

        if need_mask:
            # Ragged tail / duplicated (clamped) tiles: mask lanes whose global
            # spatial index is >= S.  Uses the UNclamped tile index so a
            # duplicated block contributes exactly zero.
            base = (pl.program_id(0) * ntps + pl.program_id(2)) * tile
            lane = jax.lax.broadcasted_iota(jnp.int32, x_blk.shape, 1)
            valid = (base + lane) < S
            cls_mask = jnp.logical_and(cls_mask, valid)
            x_pred = jnp.where(valid, x_blk, 0.0)   # protects sum_pred from garbage
        else:
            x_pred = x_blk

        inter = jnp.sum(jnp.where(cls_mask, x_blk, 0.0), axis=1, keepdims=True)
        pred = jnp.sum(x_pred, axis=1, keepdims=True)
        gt = jnp.sum(cls_mask.astype(jnp.float32), axis=1, keepdims=True)

        inter_ref[...] += inter[None, None]
        pred_ref[...] += pred[None, None]
        gt_ref[...] += gt[None, None]

    return kernel


def _dice_sums(x, y, tile_target_bytes=4 << 20):
    """Fused hot path: per-(b, c) intersect, sum_pred, sum_gt in one HBM pass."""
    B, C = x.shape[0], x.shape[1]
    S = int(math.prod(x.shape[2:]))

    xf = x.reshape(B, C, S)                         # native dtype, free reshape
    if not jnp.issubdtype(y.dtype, jnp.integer):
        y = y.astype(jnp.int32)
    yf = y.reshape(B, 1, S)                         # keep native integer width

    x_bytes = jnp.dtype(xf.dtype).itemsize
    y_bytes = jnp.dtype(yf.dtype).itemsize

    # Lane-dense spatial tile: multiple of 128, sized so the combined (x + y)
    # block is ~tile_target_bytes.  Double-buffered footprint ~2x that -> fits
    # every generation's default scoped VMEM (16 MiB v5e, 32 MiB v6e/v7x).
    per_elem = x_bytes * C + y_bytes
    elems = max(128, tile_target_bytes // per_elem)
    tile = min(_round_up(S, 128), max(128, (elems // 128) * 128))
    num_tiles = -(-S // tile)

    # v7x megacore: if B alone can't cover both TensorCores (B odd / B == 1),
    # add a parallel split of the spatial reduction.  No-op on v5e/v6e (1 TC).
    split = 2 if (B % 2 == 1 and num_tiles >= 2) else 1
    ntps = -(-num_tiles // split)                   # tiles per split
    need_mask = (split * ntps * tile) != S

    def in_map(s, b, t):
        g = s * ntps + t
        if split > 1:
            g = jnp.minimum(g, num_tiles - 1)       # never a fully-OOB block
        return (b, 0, g)

    def out_map(s, b, t):
        return (s, b, 0, 0)

    out_shape = tuple(
        jax.ShapeDtypeStruct((split, B, C, 1), jnp.float32) for _ in range(3))

    grid_spec = pltpu.PrefetchScalarGridSpec(
        num_scalar_prefetch=0,
        grid=(split, B, ntps),
        in_specs=[
            pl.BlockSpec((1, C, tile), in_map),     # x[b, :, spatial tile]
            pl.BlockSpec((1, 1, tile), in_map),     # y[b, spatial tile]
        ],
        out_specs=(
            pl.BlockSpec((1, 1, C, 1), out_map),    # intersect accumulator
            pl.BlockSpec((1, 1, C, 1), out_map),    # sum_pred accumulator
            pl.BlockSpec((1, 1, C, 1), out_map),    # sum_gt accumulator
        ),
    )

    cost = pl.CostEstimate(
        flops=int(5 * B * C * split * ntps * tile),
        transcendentals=0,
        bytes_accessed=int(xf.size * x_bytes + yf.size * y_bytes
                           + 3 * split * B * C * 4),
    )

    inter, pred, gt = pl.pallas_call(
        _make_dice_kernel(S, tile, ntps, need_mask),
        out_shape=out_shape,
        grid_spec=grid_spec,
        compiler_params=pltpu.CompilerParams(
            # (split, B) parallel -> megacore sharding; spatial tiles are the
            # reduction -> "arbitrary".  Do not flip these.
            dimension_semantics=("parallel", "parallel", "arbitrary")),
        cost_estimate=cost,
    )(xf, yf)

    # Tiny (split, B, C) partials -> reduce in JAX.
    inter = jnp.sum(inter, axis=0)[..., 0]
    pred = jnp.sum(pred, axis=0)[..., 0]
    gt = jnp.sum(gt, axis=0)[..., 0]
    return inter, pred, gt


def memory_efficient_soft_dice_loss(x, y, smooth=1.0, tile_target_bytes=4 << 20):
    """Forward of MemoryEfficientSoftDiceLoss with default flags.

    x: (B, C, *spatial) float predictions (apply_nonlin=None -> used as-is)
    y: (B, *spatial) or (B, 1, *spatial) integer class labels
    returns: scalar loss = -mean_{b,c} dice(b, c)
    """
    if y.ndim == x.ndim and y.shape[1] == 1:
        y = y.reshape((y.shape[0],) + y.shape[2:])
    # TODO(synk): y.shape == x.shape (pre-one-hot target), loss_mask, and the
    # batch_dice=True + ddp AllGather branch are not implemented here.
    intersect, sum_pred, sum_gt = _dice_sums(x, y, tile_target_bytes)
    dc = (2.0 * intersect + smooth) / jnp.clip(sum_gt + sum_pred + smooth, 1e-8)
    return -jnp.mean(dc)


def _reference_loss(x, y, smooth=1.0):
    """Pure-JAX reference mirroring the PyTorch code (correctness check)."""
    C = x.shape[1]
    axes = tuple(range(2, x.ndim))
    y_onehot = jax.nn.one_hot(y, C, axis=1, dtype=x.dtype)
    intersect = jnp.sum(x * y_onehot, axis=axes)
    sum_pred = jnp.sum(x, axis=axes)
    sum_gt = jnp.sum(y_onehot, axis=axes)
    dc = (2.0 * intersect + smooth) / jnp.clip(sum_gt + sum_pred + smooth, 1e-8)
    return -jnp.mean(dc)


if __name__ == "__main__":
    key = jax.random.PRNGKey(0)
    jit_loss = jax.jit(memory_efficient_soft_dice_loss,
                       static_argnames=("tile_target_bytes",))

    def run_case(B, C, spatial, dtype, tile_target_bytes, k):
        kx, ky = jax.random.split(k)
        x = jax.random.uniform(kx, (B, C) + spatial, dtype=jnp.float32).astype(dtype)
        y = jax.random.randint(ky, (B,) + spatial, 0, C, dtype=jnp.int32)
        loss = jax.block_until_ready(
            jit_loss(x, y, tile_target_bytes=tile_target_bytes))
        ref = jax.block_until_ready(_reference_loss(x.astype(jnp.float32), y))
        assert jnp.allclose(loss, ref, rtol=1e-5, atol=1e-5), (B, C, spatial, loss, ref)

    keys = jax.random.split(key, 5)
    # Default-sized case: one 256-lane tile per batch element, split=1.
    run_case(2, 4, (16, 16), jnp.float32, 4 << 20, keys[0])
    # bf16 predictions: native-dtype DMA, in-kernel widening.
    run_case(2, 4, (16, 16), jnp.bfloat16, 4 << 20, keys[1])
    # Non-128-multiple spatial extent, single padded block (tile > S), masked tail.
    run_case(2, 4, (17, 13), jnp.float32, 4 << 20, keys[2])
    # B=1: megacore split path + ragged tail (S=221, tile=128, 2 tiles, split=2).
    run_case(1, 3, (17, 13), jnp.float32, 256, keys[3])
    # Odd tile count under split: clamped duplicate block contributes zero (S=300).
    run_case(1, 2, (15, 20), jnp.float32, 256, keys[4])

    print("KERNEL_OK")
</pallas_src>

<mosaic_0001>
module attributes {stable_mosaic.version = 11 : i64} {
  func.func @kernel(%arg0: i32, %arg1: i32, %arg2: i32, %arg3: memref<1x4x256xf32, #tpu.memory_space<vmem>>, %arg4: memref<1x1x256xi32, #tpu.memory_space<vmem>>, %arg5: memref<1x1x4x1xf32, #tpu.memory_space<vmem>>, %arg6: memref<1x1x4x1xf32, #tpu.memory_space<vmem>>, %arg7: memref<1x1x4x1xf32, #tpu.memory_space<vmem>>) attributes {dimension_semantics = [#tpu.dimension_semantics<parallel>, #tpu.dimension_semantics<parallel>, #tpu.dimension_semantics<arbitrary>], iteration_bounds = array<i64: 1, 2, 1>, scalar_prefetch = 0 : i64, scratch_operands = 0 : i64, tpu.core_type = #tpu.core_type<tc>, window_params = [{transform_indices = @transform_0, window_bounds = array<i64: 1, 4, 256>}, {transform_indices = @transform_1, window_bounds = array<i64: 1, 1, 256>}, {transform_indices = @transform_2, window_bounds = array<i64: 1, 1, 4, 1>}, {transform_indices = @transform_3, window_bounds = array<i64: 1, 1, 4, 1>}, {transform_indices = @transform_4, window_bounds = array<i64: 1, 1, 4, 1>}]} {
    %c0_i32 = arith.constant 0 : i32
    %0 = arith.cmpi eq, %arg2, %c0_i32 : i32
    %1 = arith.extui %0 : i1 to i32
    %c0_i32_0 = arith.constant 0 : i32
    %2 = arith.cmpi ne, %1, %c0_i32_0 : i32
    scf.if %2 {
      %cst_33 = arith.constant 0.000000e+00 : f32
      %32 = vector.broadcast %cst_33 : f32 to vector<1x1x4x1xf32>
      %c0_34 = arith.constant 0 : index
      %c0_35 = arith.constant 0 : index
      %c0_36 = arith.constant 0 : index
      %c0_37 = arith.constant 0 : index
      %33 = vector.load %arg5[%c0_34, %c0_35, %c0_36, %c0_37] : memref<1x1x4x1xf32, #tpu.memory_space<vmem>>, vector<1x1x4x1xf32>
      tpu.vector_store %arg5[%c0_34, %c0_35, %c0_36, %c0_37], %32 {strides = array<i32>} : memref<1x1x4x1xf32, #tpu.memory_space<vmem>>, vector<1x1x4x1xf32>,
      %cst_38 = arith.constant 0.000000e+00 : f32
      %34 = vector.broadcast %cst_38 : f32 to vector<1x1x4x1xf32>
      %c0_39 = arith.constant 0 : index
      %c0_40 = arith.constant 0 : index
      %c0_41 = arith.constant 0 : index
      %c0_42 = arith.constant 0 : index
      %35 = vector.load %arg6[%c0_39, %c0_40, %c0_41, %c0_42] : memref<1x1x4x1xf32, #tpu.memory_space<vmem>>, vector<1x1x4x1xf32>
      tpu.vector_store %arg6[%c0_39, %c0_40, %c0_41, %c0_42], %34 {strides = array<i32>} : memref<1x1x4x1xf32, #tpu.memory_space<vmem>>, vector<1x1x4x1xf32>,
      %cst_43 = arith.constant 0.000000e+00 : f32
      %36 = vector.broadcast %cst_43 : f32 to vector<1x1x4x1xf32>
      %c0_44 = arith.constant 0 : index
      %c0_45 = arith.constant 0 : index
      %c0_46 = arith.constant 0 : index
      %c0_47 = arith.constant 0 : index
      %37 = vector.load %arg7[%c0_44, %c0_45, %c0_46, %c0_47] : memref<1x1x4x1xf32, #tpu.memory_space<vmem>>, vector<1x1x4x1xf32>
      tpu.vector_store %arg7[%c0_44, %c0_45, %c0_46, %c0_47], %36 {strides = array<i32>} : memref<1x1x4x1xf32, #tpu.memory_space<vmem>>, vector<1x1x4x1xf32>,
    } else {
    }
    %c0 = arith.constant 0 : index
    %c0_1 = arith.constant 0 : index
    %c0_2 = arith.constant 0 : index
    %3 = vector.load %arg3[%c0, %c0_1, %c0_2] : memref<1x4x256xf32, #tpu.memory_space<vmem>>, vector<1x4x256xf32>
    %4 = vector.shape_cast %3 : vector<1x4x256xf32> to vector<4x256xf32>
    %c0_3 = arith.constant 0 : index
    %c0_4 = arith.constant 0 : index
    %c0_5 = arith.constant 0 : index
    %5 = vector.load %arg4[%c0_3, %c0_4, %c0_5] : memref<1x1x256xi32, #tpu.memory_space<vmem>>, vector<1x1x256xi32>
    %6 = vector.shape_cast %5 : vector<1x1x256xi32> to vector<1x256xi32>
    %7 = tpu.iota {dimensions = array<i32: 0>} : vector<4x256xi32>
    %8 = vector.broadcast %6 : vector<1x256xi32> to vector<4x256xi32>
    %9 = arith.cmpi eq, %8, %7 : vector<4x256xi32>
    %cst = arith.constant 0.000000e+00 : f32
    %10 = vector.broadcast %cst : f32 to vector<4x256xf32>
    %11 = arith.select %9, %4, %10 : vector<4x256xi1>, vector<4x256xf32>
    %cst_6 = arith.constant dense<0.000000e+00> : vector<4xf32>
    %12 = vector.multi_reduction <add>, %11, %cst_6 [1] : vector<4x256xf32> to vector<4xf32>
    %13 = vector.shape_cast %12 : vector<4xf32> to vector<4x1xf32>
    %cst_7 = arith.constant dense<0.000000e+00> : vector<4xf32>
    %14 = vector.multi_reduction <add>, %4, %cst_7 [1] : vector<4x256xf32> to vector<4xf32>
    %15 = vector.shape_cast %14 : vector<4xf32> to vector<4x1xf32>
    %16 = arith.extui %9 : vector<4x256xi1> to vector<4x256xi32>
    %17 = arith.sitofp %16 : vector<4x256xi32> to vector<4x256xf32>
    %cst_8 = arith.constant dense<0.000000e+00> : vector<4xf32>
    %18 = vector.multi_reduction <add>, %17, %cst_8 [1] : vector<4x256xf32> to vector<4xf32>
    %19 = vector.shape_cast %18 : vector<4xf32> to vector<4x1xf32>
    %c0_9 = arith.constant 0 : index
    %c0_10 = arith.constant 0 : index
    %c0_11 = arith.constant 0 : index
    %c0_12 = arith.constant 0 : index
    %20 = vector.load %arg5[%c0_9, %c0_10, %c0_11, %c0_12] : memref<1x1x4x1xf32, #tpu.memory_space<vmem>>, vector<1x1x4x1xf32>
    %21 = vector.shape_cast %13 : vector<4x1xf32> to vector<1x1x4x1xf32>
    %22 = arith.addf %20, %21 : vector<1x1x4x1xf32>
    %c0_13 = arith.constant 0 : index
    %c0_14 = arith.constant 0 : index
    %c0_15 = arith.constant 0 : index
    %c0_16 = arith.constant 0 : index
    %23 = vector.load %arg5[%c0_13, %c0_14, %c0_15, %c0_16] : memref<1x1x4x1xf32, #tpu.memory_space<vmem>>, vector<1x1x4x1xf32>
    tpu.vector_store %arg5[%c0_13, %c0_14, %c0_15, %c0_16], %22 {strides = array<i32>} : memref<1x1x4x1xf32, #tpu.memory_space<vmem>>, vector<1x1x4x1xf32>,
    %c0_17 = arith.constant 0 : index
    %c0_18 = arith.constant 0 : index
    %c0_19 = arith.constant 0 : index
    %c0_20 = arith.constant 0 : index
    %24 = vector.load %arg6[%c0_17, %c0_18, %c0_19, %c0_20] : memref<1x1x4x1xf32, #tpu.memory_space<vmem>>, vector<1x1x4x1xf32>
    %25 = vector.shape_cast %15 : vector<4x1xf32> to vector<1x1x4x1xf32>
    %26 = arith.addf %24, %25 : vector<1x1x4x1xf32>
    %c0_21 = arith.constant 0 : index
    %c0_22 = arith.constant 0 : index
    %c0_23 = arith.constant 0 : index
    %c0_24 = arith.constant 0 : index
    %27 = vector.load %arg6[%c0_21, %c0_22, %c0_23, %c0_24] : memref<1x1x4x1xf32, #tpu.memory_space<vmem>>, vector<1x1x4x1xf32>
    tpu.vector_store %arg6[%c0_21, %c0_22, %c0_23, %c0_24], %26 {strides = array<i32>} : memref<1x1x4x1xf32, #tpu.memory_space<vmem>>, vector<1x1x4x1xf32>,
    %c0_25 = arith.constant 0 : index
    %c0_26 = arith.constant 0 : index
    %c0_27 = arith.constant 0 : index
    %c0_28 = arith.constant 0 : index
    %28 = vector.load %arg7[%c0_25, %c0_26, %c0_27, %c0_28] : memref<1x1x4x1xf32, #tpu.memory_space<vmem>>, vector<1x1x4x1xf32>
    %29 = vector.shape_cast %19 : vector<4x1xf32> to vector<1x1x4x1xf32>
    %30 = arith.addf %28, %29 : vector<1x1x4x1xf32>
    %c0_29 = arith.constant 0 : index
    %c0_30 = arith.constant 0 : index
    %c0_31 = arith.constant 0 : index
    %c0_32 = arith.constant 0 : index
    %31 = vector.load %arg7[%c0_29, %c0_30, %c0_31, %c0_32] : memref<1x1x4x1xf32, #tpu.memory_space<vmem>>, vector<1x1x4x1xf32>
    tpu.vector_store %arg7[%c0_29, %c0_30, %c0_31, %c0_32], %30 {strides = array<i32>} : memref<1x1x4x1xf32, #tpu.memory_space<vmem>>, vector<1x1x4x1xf32>,
    return
  }
  func.func @transform_0(%arg0: i32, %arg1: i32, %arg2: i32) -> (i32, i32, i32) {
    %c1_i32 = arith.constant 1 : i32
    %0 = arith.muli %arg0, %c1_i32 : i32
    %1 = arith.addi %0, %arg2 : i32
    %c0_i32 = arith.constant 0 : i32
    %c0_i32_0 = arith.constant 0 : i32
    return %arg1, %c0_i32, %1 : i32, i32, i32
  }
  func.func @transform_1(%arg0: i32, %arg1: i32, %arg2: i32) -> (i32, i32, i32) {
    %c1_i32 = arith.constant 1 : i32
    %0 = arith.muli %arg0, %c1_i32 : i32
    %1 = arith.addi %0, %arg2 : i32
    %c0_i32 = arith.constant 0 : i32
    %c0_i32_0 = arith.constant 0 : i32
    return %arg1, %c0_i32, %1 : i32, i32, i32
  }
  func.func @transform_2(%arg0: i32, %arg1: i32, %arg2: i32) -> (i32, i32, i32, i32) {
    %c0_i32 = arith.constant 0 : i32
    %c0_i32_0 = arith.constant 0 : i32
    %c0_i32_1 = arith.constant 0 : i32
    return %arg0, %arg1, %c0_i32, %c0_i32_0 : i32, i32, i32, i32
  }
  func.func @transform_3(%arg0: i32, %arg1: i32, %arg2: i32) -> (i32, i32, i32, i32) {
    %c0_i32 = arith.constant 0 : i32
    %c0_i32_0 = arith.constant 0 : i32
    %c0_i32_1 = arith.constant 0 : i32
    return %arg0, %arg1, %c0_i32, %c0_i32_0 : i32, i32, i32, i32
  }
  func.func @transform_4(%arg0: i32, %arg1: i32, %arg2: i32) -> (i32, i32, i32, i32) {
    %c0_i32 = arith.constant 0 : i32
    %c0_i32_0 = arith.constant 0 : i32
    %c0_i32_1 = arith.constant 0 : i32
    return %arg0, %arg1, %c0_i32, %c0_i32_0 : i32, i32, i32, i32
  }
}

</mosaic_0001>

<bundles_post_ra>
// kernel: memory_efficient_soft_dice_loss.1
= control target key start
LH: loop header
LB: loop body
LE: loop exit
PB: predicated region body
PF: predicated region fallthrough
CT: control target
= control target key end

     0   :  { %s673_s15 = smov 0   ;;  %s675_s16 = smov 0   ;;  %s726_s0 = inlined_call_operand.vmem [shape: f32[2,4,256], index: 0, kind: input, shape index: {}]   ;;  %s727_s1 = inlined_call_operand.vmem [shape: s32[2,1,256], index: 1, kind: input, shape index: {}]   ;;  %s728_s2 = inlined_call_operand.vmem [shape: f32[1,2,4,1], index: 2, kind: output, shape index: {0}]   ;;  %s729_s3 = inlined_call_operand.vmem [shape: f32[1,2,4,1], index: 3, kind: output, shape index: {1}]   ;;  %s730_s4 = inlined_call_operand.vmem [shape: f32[1,2,4,1], index: 4, kind: output, shape index: {2}]  }
   0x1   :  { %s677_s17 = smov 0  }
   0x2 LB: > { %s30_s18 = sadd.s32 1, %s641_s16  ;;  %p585_p0 = scmp.ge.s32.totalorder %s645_s17, 1  ;;  %s645_s17 = sphi %s677_s17, %s15_s17   ;;  %s641_s16 = sphi %s675_s16, %s732_s16   ;;  %s637_s15 = sphi %s673_s15, %s731_s15  }
   0x3   : > { %p32_p1 = scmp.ge.s32.totalorder %s30_s18, 2  ;;  %p223_p2 = scmp.lt.s32.totalorder %s645_s17, 3 }
   0x5   : > { %s734_s18 = smov (%p32_p1, %s30_s18), 0  ;;  %p224_p3 = pnand %p585_p0, %p223_p2 }
   0x6   : > { %p284_p4 = scmp.lt.s32.totalorder (!%p224_p3), %s637_s15, 1  ;;  %v339_v0 = vlaneseq (!%p224_p3)  ;;  %vm333_vm0 = vcmask (!%p224_p3), 3072   ;;  %vm356_vm1 = vcmask (!%p224_p3), 1043456   ;;  %v647_v9 = vmov (!%p224_p3), 0.0  }
   0x7   : > { %227 = sbr.rel (%p224_p3) target bundleno = 175 (0xaf), region = 28 }
   0x8   : > { %v340_v1 = vshrl.u32 (!%p224_p3), %v339_v0, 7 }
   0xa   : > { %v343_v2 = vsub.s32 (!%p224_p3), 0, %v340_v1  ;;  %v347_v3 = vsub.s32 (!%p224_p3), 1, %v340_v1 }
   0xe   : > { %s736_s15 = smov (!%p284_p4, %s637_s15), 1 }
   0xf   : > { %s596_s19 = sshll.u32 %s736_s15, 3  ;;  %s588_s20 = sshll.u32 %s736_s15, 1 }
  0x10   : > { %s291_s23 = scalar_lea.vmem %s726_s0, %s596_s19  ;;  %s302_s26 = scalar_lea.vmem %s727_s1, %s588_s20 }
  0x11   : > { %v337_v4 = vld [vmem:[%s291_s23] sm:$0xff]  ;;  %s589_s27 = sshll.u32 %s736_s15, 2 }
  0x12   : > { %v338_v5 = vld [vmem:[%s302_s26] sm:$0x3]  ;;  %v352_v8 = vcombine.high %v337_v4, %v337_v4  ;;  %s700_s30 = scalar_lea.vmem %s728_s2, %s589_s27  ;;  %v362_v10 = vsel %vm356_vm1, %v337_v4, 0.0  ;;  %s328_s7 = scalar_lea.vmem %s730_s4, %s589_s27 }
  0x13   : > { %v344_v6 = vrot.slane %v338_v5, %v343_v2  ;;  %v348_v7 = vrot.slane %v338_v5, %v347_v3  ;;  %334 = vst.msk [vmem:[%s700_s30] sm:$0xf] %vm333_vm0, %v647_v9  ;;  %s320_s10 = scalar_lea.vmem %s729_s3, %s589_s27  ;;  %336 = vst.msk [vmem:[%s328_s7] sm:$0xf] %vm333_vm0, %v647_v9 }
  0x14   : > { %v363_v11 = vsel %vm356_vm1, %v352_v8, 0.0  ;;  %335 = vst.msk [vmem:[%s320_s10] sm:$0xf] %vm333_vm0, %v647_v9 }
  0x15   : > { %vm349_vm2 = vcmp.eq.s32.totalorder %v344_v6, %v340_v1  ;;  %vm350_vm3 = vcmp.eq.s32.totalorder %v348_v7, %v340_v1  ;;  %v364_v22 = vadd.f32 %v363_v11, %v362_v10 }
  0x16   : > { %v354_v12 = vsel %vm349_vm2, %v337_v4, 0.0  ;;  %v355_v13 = vsel %vm350_vm3, %v352_v8, 0.0  ;;  %v592_v14 = vsel %vm349_vm2, 1.0, %v647_v9  ;;  %v593_v15 = vsel %vm350_vm3, 1.0, %v647_v9 }
  0x17   : > { %v357_v16 = vsel %vm356_vm1, %v354_v12, 0.0  ;;  %v358_v17 = vsel %vm356_vm1, %v355_v13, 0.0  ;;  %v371_v18 = vsel %vm356_vm1, %v592_v14, 0.0  ;;  %v372_v19 = vsel %vm356_vm1, %v593_v15, 0.0 }
  0x18   : > { %v359_v20 = vadd.f32 %v358_v17, %v357_v16  ;;  %v373_v21 = vadd.f32 %v372_v19, %v371_v18 }
  0x1a   : > { %360 = vadd.xlane.f32.xlu0 %v359_v20  ;;  %374 = vadd.xlane.f32.xlu1 %v373_v21  ;;  %v376_v23 = vld [vmem:[%s700_s30] sm:$0xf] }
  0x1b   : > { %v383_v24 = vld [vmem:[%s328_s7] sm:$0xf] }
  0x1c   : > { %v380_v29 = vld [vmem:[%s320_s10] sm:$0xf] }
  0x1e   : > { %365 = vadd.xlane.f32.xlu0 %v364_v22 }
  0xa7   : > { %v361_v25 = vpop.xlane.xlu0 %360  ;;  %v375_v26 = vpop.xlane.xlu1 %374 }
  0xa8   : > { %v377_v27 = vadd.f32 %v376_v23, %v361_v25  ;;  %v384_v28 = vadd.f32 %v383_v24, %v375_v26 }
  0xaa   : > { %379 = vst.msk [vmem:[%s700_s30] sm:$0xf] %vm333_vm0, %v377_v27  ;;  %385 = vst.msk [vmem:[%s328_s7] sm:$0xf] %vm333_vm0, %v384_v28 }
  0xab   : > { %v366_v30 = vpop.xlane.xlu0 %365 }
  0xac   : > { %v381_v31 = vadd.f32 %v380_v29, %v366_v30 }
  0xae   : > { %382 = vst.msk [vmem:[%s320_s10] sm:$0xf] %vm333_vm0, %v381_v31 }
  0xaf PF: > { %s15_s17 = sadd.s32 1, %s645_s17   ;;  %s731_s15 = smov %s641_s16 }
  0xb0   : > { %p12_p5 = scmp.ge.s32.totalorder %s15_s17, 4   ;;  %s732_s16 = smov %s734_s18 }
  0xb2   :  { %14 = sbr.rel (!%p12_p5) target bundleno = 2 (0x2), region = 89 }

</bundles_post_ra>
